<compile_context>
chip_gen: v7x
topology: tpu7x:2x2x1
jax: 0.10.0
libtpu: 0.0.40
codegen_flags: <defaults>
</compile_context>

<pallas_src>
import numpy as np
import jax
import jax.numpy as jnp
from jax.experimental import pallas as pl
from jax.experimental.pallas import tpu as pltpu


def build_grid(resolution):
    """Same construction as the PyTorch helper, returns (1, H, W, 4) float32."""
    ranges = [np.linspace(0.0, 1.0, num=res) for res in resolution]
    grid = np.meshgrid(*ranges, sparse=False, indexing="ij")
    grid = np.stack(grid, axis=-1)
    grid = np.reshape(grid, [resolution[0], resolution[1], -1])
    grid = np.expand_dims(grid, axis=0)
    grid = grid.astype(np.float32)
    grid = np.concatenate([grid, 1.0 - grid], axis=-1)
    return jnp.asarray(grid)  # (1, H, W, 4)


# ---------------------------------------------------------------------------
# Fused kernel: out = x + (W @ grid^T + b), computed per spatial tile.
#   g_ref : (4, ts)        grid features, lane-dense spatial tile (f32)
#   w_ref : (C, 4)         nn.Linear weight (PyTorch layout), full block
#   b_ref : (C, 1)         nn.Linear bias, full block
#   x_ref : (bb, C, ts)    activation tile (NCHW, spatial flattened)
#   o_ref : (bb, C, ts)
# The K=4 contraction is 4 VPU broadcast-FMAs; they ride for free under the
# x/out DMA of this memory-bound kernel.
# ---------------------------------------------------------------------------
def _soft_pos_embed_kernel(g_ref, w_ref, b_ref, x_ref, o_ref):
    g = g_ref[...]          # (4, ts)   f32
    w = w_ref[...]          # (C, 4)    f32
    b = b_ref[...]          # (C, 1)    f32
    pe = (w[:, 0:1] * g[0:1, :]
          + w[:, 1:2] * g[1:2, :]
          + w[:, 2:3] * g[2:3, :]
          + w[:, 3:4] * g[3:4, :]) + b          # (C, ts) f32
    o_ref[...] = x_ref[...] + pe[None].astype(x_ref.dtype)


# Keep the (double-buffer counted) VMEM footprint well under v5e's 16 MiB
# default scoped limit (the tightest of v5e/v6e/v7x defaults).
_VMEM_BUDGET_BYTES = 10 * 1024 * 1024


def _per_lane_bytes(bb, c, itemsize):
    # x in + out, each double-buffered, plus the (4, ts) f32 grid tile x2.
    return 4 * bb * c * itemsize + 2 * 4 * 4


def _pick_spatial_tile(hw, bb, c, itemsize, budget=_VMEM_BUDGET_BYTES):
    """hw is a multiple of 128.  Largest multiple-of-128 divisor of hw whose
    pipelined block footprint fits the budget; if a single tile would cover
    everything but the problem is large, split in two so v7x's two
    TensorCores each get a parallel grid step."""
    per_lane = _per_lane_bytes(bb, c, itemsize)
    cap = max(128, (budget // per_lane) // 128 * 128)
    ts = min(hw, cap)
    while ts > 128 and hw % ts != 0:
        ts -= 128
    if ts == hw and hw % 256 == 0 and hw // 2 >= 512:
        ts = hw // 2          # >= 2 parallel grid steps for v7x's 2 TCs
    return ts


def soft_position_embed(inputs_nchw, grid_1hw4, weight, bias):
    """inputs_nchw: (B, C, H, W); grid_1hw4: (1, H, W, 4);
    weight: (C, 4) [PyTorch nn.Linear layout]; bias: (C,)."""
    B, C, H, W = inputs_nchw.shape
    HW = H * W
    dtype = inputs_nchw.dtype
    itemsize = jnp.dtype(dtype).itemsize

    # Layout plumbing (cheap, done once): grid as (4, HW) f32, params as 2-D.
    g2 = jnp.transpose(jnp.reshape(grid_1hw4[0], (HW, 4)))      # (4, HW)
    w2 = weight.astype(jnp.float32)                             # (C, 4)
    b2 = bias.reshape(C, 1).astype(jnp.float32)                 # (C, 1)
    x3 = inputs_nchw.reshape(B, C, HW)   # contiguous reshape, no data move

    # Fold the whole batch into one block when it fits the VMEM budget even at
    # the minimal 128-lane tile; otherwise keep batch as an (inner) grid axis.
    fold_batch = _per_lane_bytes(B, C, itemsize) * 128 <= _VMEM_BUDGET_BYTES
    bb = B if fold_batch else 1

    # Spatial tiling: keep the lane axis a multiple of 128 whenever possible.
    hw_work, pad = HW, 0
    if HW % 128 != 0:
        if _per_lane_bytes(bb, C, itemsize) * HW <= _VMEM_BUDGET_BYTES:
            ts = HW                       # full-extent (ragged) block is legal
        else:
            pad = (-HW) % 128             # pad to a lane-dense multiple of 128
            hw_work = HW + pad
            x3 = jnp.pad(x3, ((0, 0), (0, 0), (0, pad)))
            g2 = jnp.pad(g2, ((0, 0), (0, pad)))
            ts = _pick_spatial_tile(hw_work, bb, C, itemsize)
    else:
        ts = _pick_spatial_tile(hw_work, bb, C, itemsize)
    nt = hw_work // ts

    if fold_batch:
        kernel_grid = (nt,)
        in_specs = [
            pl.BlockSpec((4, ts), lambda t: (0, t)),           # grid features
            pl.BlockSpec((C, 4), lambda t: (0, 0)),            # weight (resident)
            pl.BlockSpec((C, 1), lambda t: (0, 0)),            # bias   (resident)
            pl.BlockSpec((B, C, ts), lambda t: (0, 0, t)),     # x
        ]
        out_specs = pl.BlockSpec((B, C, ts), lambda t: (0, 0, t))
        dims = ("parallel",)
    else:
        # Batch innermost: grid/weight/bias block indices are constant across
        # it, so their re-DMA is skipped by the pipeline.
        kernel_grid = (nt, B)
        in_specs = [
            pl.BlockSpec((4, ts), lambda t, b: (0, t)),
            pl.BlockSpec((C, 4), lambda t, b: (0, 0)),
            pl.BlockSpec((C, 1), lambda t, b: (0, 0)),
            pl.BlockSpec((1, C, ts), lambda t, b: (b, 0, t)),
        ]
        out_specs = pl.BlockSpec((1, C, ts), lambda t, b: (b, 0, t))
        dims = ("parallel", "parallel")

    out3 = pl.pallas_call(
        _soft_pos_embed_kernel,
        out_shape=jax.ShapeDtypeStruct((B, C, hw_work), dtype),
        grid=kernel_grid,
        in_specs=in_specs,
        out_specs=out_specs,
        compiler_params=pltpu.CompilerParams(dimension_semantics=dims),
        # If the caller donates the activation buffer, alias it to the output
        # to avoid a second (B, C, H, W) HBM allocation:
        # input_output_aliases={3: 0},
    )(g2, w2, b2, x3)

    if pad:
        out3 = out3[:, :, :HW]
    return out3.reshape(B, C, H, W)


def reference(inputs_nchw, grid_1hw4, weight, bias):
    pe = jnp.einsum("bhwf,cf->bhwc", grid_1hw4, weight) + bias  # (1, H, W, C)
    return inputs_nchw + jnp.transpose(pe, (0, 3, 1, 2))


if __name__ == "__main__":
    B, hidden, H, W = 2, 32, 16, 16
    key = jax.random.PRNGKey(0)
    k_x, k_w, k_b = jax.random.split(key, 3)

    # Deterministic synthetic parameters (nn.Linear(4, hidden) shapes).
    weight = jax.random.normal(k_w, (hidden, 4), dtype=jnp.float32) * 0.5
    bias = jax.random.normal(k_b, (hidden,), dtype=jnp.float32) * 0.1

    inputs = jax.random.normal(k_x, (B, hidden, H, W), dtype=jnp.float32)
    grid = build_grid((H, W))  # (1, H, W, 4)

    out = soft_position_embed(inputs, grid, weight, bias)
    out = jax.block_until_ready(out)

    ref = reference(inputs, grid, weight, bias)
    np.testing.assert_allclose(np.asarray(out), np.asarray(ref),
                               rtol=1e-5, atol=1e-5)
    print("KERNEL_OK")
</pallas_src>

<mosaic_0001>
module attributes {stable_mosaic.version = 11 : i64} {
  func.func @_soft_pos_embed_kernel(%arg0: i32, %arg1: memref<4x256xf32, #tpu.memory_space<vmem>>, %arg2: memref<32x4xf32, #tpu.memory_space<vmem>>, %arg3: memref<32x1xf32, #tpu.memory_space<vmem>>, %arg4: memref<2x32x256xf32, #tpu.memory_space<vmem>>, %arg5: memref<2x32x256xf32, #tpu.memory_space<vmem>>) attributes {dimension_semantics = [#tpu.dimension_semantics<parallel>], iteration_bounds = array<i64: 1>, scalar_prefetch = 0 : i64, scratch_operands = 0 : i64, tpu.core_type = #tpu.core_type<tc>, window_params = [{transform_indices = @transform_0, window_bounds = array<i64: 4, 256>}, {pipeline_mode = #tpu.pipeline_mode<synchronous>, transform_indices = @transform_1, window_bounds = array<i64: 32, 4>}, {pipeline_mode = #tpu.pipeline_mode<synchronous>, transform_indices = @transform_2, window_bounds = array<i64: 32, 1>}, {transform_indices = @transform_3, window_bounds = array<i64: 2, 32, 256>}, {transform_indices = @transform_4, window_bounds = array<i64: 2, 32, 256>}]} {
    %c0 = arith.constant 0 : index
    %c0_0 = arith.constant 0 : index
    %0 = vector.load %arg1[%c0, %c0_0] : memref<4x256xf32, #tpu.memory_space<vmem>>, vector<4x256xf32>
    %c0_1 = arith.constant 0 : index
    %c0_2 = arith.constant 0 : index
    %1 = vector.load %arg2[%c0_1, %c0_2] : memref<32x4xf32, #tpu.memory_space<vmem>>, vector<32x4xf32>
    %c0_3 = arith.constant 0 : index
    %c0_4 = arith.constant 0 : index
    %2 = vector.load %arg3[%c0_3, %c0_4] : memref<32x1xf32, #tpu.memory_space<vmem>>, vector<32x1xf32>
    %3 = vector.extract_strided_slice %1 {offsets = [0, 0], sizes = [32, 1], strides = [1, 1]} : vector<32x4xf32> to vector<32x1xf32>
    %4 = vector.extract_strided_slice %0 {offsets = [0, 0], sizes = [1, 256], strides = [1, 1]} : vector<4x256xf32> to vector<1x256xf32>
    %5 = vector.broadcast %3 : vector<32x1xf32> to vector<32x256xf32>
    %6 = vector.broadcast %4 : vector<1x256xf32> to vector<32x256xf32>
    %7 = arith.mulf %5, %6 : vector<32x256xf32>
    %8 = vector.extract_strided_slice %1 {offsets = [0, 1], sizes = [32, 1], strides = [1, 1]} : vector<32x4xf32> to vector<32x1xf32>
    %9 = vector.extract_strided_slice %0 {offsets = [1, 0], sizes = [1, 256], strides = [1, 1]} : vector<4x256xf32> to vector<1x256xf32>
    %10 = vector.broadcast %8 : vector<32x1xf32> to vector<32x256xf32>
    %11 = vector.broadcast %9 : vector<1x256xf32> to vector<32x256xf32>
    %12 = arith.mulf %10, %11 : vector<32x256xf32>
    %13 = arith.addf %7, %12 : vector<32x256xf32>
    %14 = vector.extract_strided_slice %1 {offsets = [0, 2], sizes = [32, 1], strides = [1, 1]} : vector<32x4xf32> to vector<32x1xf32>
    %15 = vector.extract_strided_slice %0 {offsets = [2, 0], sizes = [1, 256], strides = [1, 1]} : vector<4x256xf32> to vector<1x256xf32>
    %16 = vector.broadcast %14 : vector<32x1xf32> to vector<32x256xf32>
    %17 = vector.broadcast %15 : vector<1x256xf32> to vector<32x256xf32>
    %18 = arith.mulf %16, %17 : vector<32x256xf32>
    %19 = arith.addf %13, %18 : vector<32x256xf32>
    %20 = vector.extract_strided_slice %1 {offsets = [0, 3], sizes = [32, 1], strides = [1, 1]} : vector<32x4xf32> to vector<32x1xf32>
    %21 = vector.extract_strided_slice %0 {offsets = [3, 0], sizes = [1, 256], strides = [1, 1]} : vector<4x256xf32> to vector<1x256xf32>
    %22 = vector.broadcast %20 : vector<32x1xf32> to vector<32x256xf32>
    %23 = vector.broadcast %21 : vector<1x256xf32> to vector<32x256xf32>
    %24 = arith.mulf %22, %23 : vector<32x256xf32>
    %25 = arith.addf %19, %24 : vector<32x256xf32>
    %26 = vector.broadcast %2 : vector<32x1xf32> to vector<32x256xf32>
    %27 = arith.addf %25, %26 : vector<32x256xf32>
    %c0_5 = arith.constant 0 : index
    %c0_6 = arith.constant 0 : index
    %c0_7 = arith.constant 0 : index
    %28 = vector.load %arg4[%c0_5, %c0_6, %c0_7] : memref<2x32x256xf32, #tpu.memory_space<vmem>>, vector<2x32x256xf32>
    %29 = vector.shape_cast %27 : vector<32x256xf32> to vector<1x32x256xf32>
    %30 = vector.broadcast %29 : vector<1x32x256xf32> to vector<2x32x256xf32>
    %31 = arith.addf %28, %30 : vector<2x32x256xf32>
    %c0_8 = arith.constant 0 : index
    %c0_9 = arith.constant 0 : index
    %c0_10 = arith.constant 0 : index
    %32 = vector.load %arg5[%c0_8, %c0_9, %c0_10] : memref<2x32x256xf32, #tpu.memory_space<vmem>>, vector<2x32x256xf32>
    tpu.vector_store %arg5[%c0_8, %c0_9, %c0_10], %31 {strides = array<i32>} : memref<2x32x256xf32, #tpu.memory_space<vmem>>, vector<2x32x256xf32>,
    return
  }
  func.func @transform_0(%arg0: i32) -> (i32, i32) {
    %c0_i32 = arith.constant 0 : i32
    %c0_i32_0 = arith.constant 0 : i32
    return %c0_i32, %arg0 : i32, i32
  }
  func.func @transform_1(%arg0: i32) -> (i32, i32) {
    %c0_i32 = arith.constant 0 : i32
    %c0_i32_0 = arith.constant 0 : i32
    %c0_i32_1 = arith.constant 0 : i32
    return %c0_i32, %c0_i32_0 : i32, i32
  }
  func.func @transform_2(%arg0: i32) -> (i32, i32) {
    %c0_i32 = arith.constant 0 : i32
    %c0_i32_0 = arith.constant 0 : i32
    %c0_i32_1 = arith.constant 0 : i32
    return %c0_i32, %c0_i32_0 : i32, i32
  }
  func.func @transform_3(%arg0: i32) -> (i32, i32, i32) {
    %c0_i32 = arith.constant 0 : i32
    %c0_i32_0 = arith.constant 0 : i32
    %c0_i32_1 = arith.constant 0 : i32
    return %c0_i32, %c0_i32_0, %arg0 : i32, i32, i32
  }
  func.func @transform_4(%arg0: i32) -> (i32, i32, i32) {
    %c0_i32 = arith.constant 0 : i32
    %c0_i32_0 = arith.constant 0 : i32
    %c0_i32_1 = arith.constant 0 : i32
    return %c0_i32, %c0_i32_0, %arg0 : i32, i32, i32
  }
}

</mosaic_0001>

<bundles_post_ra>
// kernel: tpu_custom_call.1
= control target key start
LH: loop header
LB: loop body
LE: loop exit
PB: predicated region body
PF: predicated region fallthrough
CT: control target
= control target key end

     0   :  { %9 = vsyncpa [#allocation3], 0  ;;  %s491_s0 = inlined_call_operand.vmem [shape: f32[4,256], index: 0, kind: input, shape index: {}]   ;;  %s492_s1 = inlined_call_operand.vmem [shape: f32[32,4], index: 1, kind: input, shape index: {}]   ;;  %s493_s2 = inlined_call_operand.vmem [shape: f32[32,1], index: 2, kind: input, shape index: {}]   ;;  %s494_s3 = inlined_call_operand.hbm [shape: f32[2,32,256], index: 3, kind: input, shape index: {}]   ;;  %s495_s4 = inlined_call_operand.hbm [shape: f32[2,32,256], index: 4, kind: output, shape index: {}]  }
   0x1   :  { %10 = vsyncpa [#allocation4], 0  ;;  %s397_s15 = smov [#allocation2]   ;;  %s349_s19 = scalar_lea.hbm %s494_s3, 2048 }
   0x2   :  { %s22_s16 = sshll.u32 %s397_s15, 4  ;;  %p350_p0 = scmp.ne.s32.totalorder %s494_s3, %s349_s19  ;;  %s23_s16 = int_to_ptr.vmem [resolvable:$true] %s22_s16 }
   0x3   :  { %p353_p1 = scmp.lt.u32.totalorder %s349_s19, %s494_s3 }
   0x5   :  { %p355_p2 = pnand %p353_p1, %p350_p0 }
   0x7   :  { %358 = shalt.err (!%p355_p2)
}
   0x8   :  { %s359_s24 = scalar_lea.vmem %s23_s16, 2048  ;;  %p364_p4 = scmp.lt.s32.totalorder %s23_s16, %s23_s16 }
   0x9   :  { %p360_p3 = scmp.ne.s32.totalorder %s23_s16, %s359_s24  ;;  %p365_p5 = scmp.lt.s32.totalorder %s359_s24, %s359_s24 }
   0xb   :  { %p366_p6 = por %p365_p5, %p364_p4 }
   0xd   :  { %p367_p7 = pnand %p366_p6, %p360_p3 }
   0xf   :  { %370 = shalt.err (!%p367_p7)
}
  0x10   :  { %s398_s25 = smov 256   ;;  %s399_s26 = smov 16  }
  0x11   :  { %28 = dma.hbm_to_vmem [thread:$0]  %s494_s3, 2048, %s23_s16, [#allocation3], %s398_s25, %s398_s25, %s399_s26  }
  0x12   :  { %393 = dma.done.wait [#allocation3], 2048  }
  0x13   :  { %394 = vsyncadd [#allocation3], 4294965248  ;;  %v400_v0 = vmov 0   ;;  %v35_v1 = vld [vmem:[%s492_s1 + $0x10] sm:$0xff]  ;;  %v33_v2 = vld [vmem:[%s492_s1] sm:$0xff]  ;;  %v401_v5 = vmov 1   ;;  %v62_v16 = vlaneseq }
  0x14   :  { %340 = vset.pattern.permute.xlu1 %v400_v0  ;;  %339 = vset.pattern.permute.xlu0 %v400_v0  ;;  %v36_v3 = vld [vmem:[%s492_s1 + $0x18] sm:$0xff]  ;;  %v34_v4 = vld [vmem:[%s492_s1 + $0x8] sm:$0xff]  ;;  %v402_v6 = vmov 2   ;;  %v403_v7 = vmov 3   ;;  %v37_v9 = vld [vmem:[%s493_s2] sm:$0xff] }
  0x15   :  { %53 = vperm.xlu1 %340, %v35_v1   ;;  %43 = vperm.xlu0 %339, %v33_v2   ;;  %v38_v8 = vld [vmem:[%s493_s2 + $0x8] sm:$0xff]  ;;  %v39_v10 = vld [vmem:[%s493_s2 + $0x10] sm:$0xff]  ;;  %v40_v11 = vld [vmem:[%s493_s2 + $0x18] sm:$0xff]  ;;  %v63_v19 = vshrl.u32 %v62_v16, 7 }
  0x16   :  { %v32_v28 = vld [vmem:[%s491_s0] sm:$0xff]  ;;  %s404_s0 = smov [#allocation5]  }
  0x17   :  { %v106_v22 = vsub.s32 1, %v63_v19  ;;  %v110_v23 = vsub.s32 5, %v63_v19  ;;  %v64_v24 = vsub.s32 0, %v63_v19  ;;  %v68_v25 = vsub.s32 4, %v63_v19  ;;  %s319_s18 = sshll.u32 %s404_s0, 4  ;;  %s320_s18 = int_to_ptr.vmem [resolvable:$true] %s319_s18 }
  0x18   :  { %v156_v26 = vsub.s32 2, %v63_v19  ;;  %v160_v27 = vsub.s32 6, %v63_v19  ;;  %v206_v37 = vsub.s32 3, %v63_v19  ;;  %v210_v38 = vsub.s32 7, %v63_v19  ;;  %s371_s19 = scalar_lea.vmem %s320_s18, 2048  ;;  %p376_p9 = scmp.lt.s32.totalorder %s320_s18, %s320_s18 }
  0x19   :  { %58 = vperm.xlu1 %340, %v36_v3   ;;  %48 = vperm.xlu0 %339, %v34_v4   ;;  %v107_v29 = vrot.slane %v32_v28, %v106_v22  ;;  %v111_v30 = vrot.slane %v32_v28, %v110_v23  ;;  %v65_v33 = vrot.slane %v32_v28, %v64_v24  ;;  %p372_p8 = scmp.ne.s32.totalorder %s320_s18, %s371_s19  ;;  %p377_p10 = scmp.lt.s32.totalorder %s371_s19, %s371_s19 }
  0x1a   :  { %v69_v34 = vrot.slane %v32_v28, %v68_v25  ;;  %v157_v35 = vrot.slane %v32_v28, %v156_v26  ;;  %v161_v36 = vrot.slane %v32_v28, %v160_v27  ;;  %v207_v47 = vrot.slane %v32_v28, %v206_v37 }
  0x1b   :  { %v117_v39 = vrot.slane %v107_v29, %v106_v22  ;;  %v121_v40 = vrot.slane %v111_v30, %v106_v22  ;;  %v75_v43 = vrot.slane %v65_v33, %v64_v24  ;;  %v211_v48 = vrot.slane %v32_v28, %v210_v38  ;;  %v277_v33 = vld [vmem:[#allocation2 + $0x58] sm:$0xff]  ;;  %p378_p11 = por %p377_p10, %p376_p9 }
  0x1c   :  { %v79_v44 = vrot.slane %v69_v34, %v64_v24  ;;  %v167_v45 = vrot.slane %v157_v35, %v156_v26  ;;  %v171_v46 = vrot.slane %v161_v36, %v156_v26  ;;  %v217_v62 = vrot.slane %v207_v47, %v206_v37  ;;  %v268_v24 = vld [vmem:[#allocation2 + $0x10] sm:$0xff] }
  0x1d   :  { %342 = vset.pattern.permute.xlu1 %v401_v5  ;;  %341 = vset.pattern.permute.xlu0 %v401_v5  ;;  %v221_v63 = vrot.slane %v211_v48, %v206_v37  ;;  %v266_v48 = vld [vmem:[#allocation2] sm:$0xff]  ;;  %p379_p12 = pnand %p378_p11, %p372_p8 }
  0x1e   :  { %93 = vperm.xlu1 %342, %v34_v4   ;;  %89 = vperm.xlu0 %341, %v33_v2  }
  0x22   :  { %97 = vperm.xlu1 %342, %v35_v1   ;;  %101 = vperm.xlu0 %341, %v36_v3  }
  0x26   :  { %343 = vset.pattern.permute.xlu1 %v402_v6  ;;  %344 = vset.pattern.permute.xlu0 %v402_v6 }
  0x27   :  { %139 = vperm.xlu1 %343, %v33_v2   ;;  %143 = vperm.xlu0 %344, %v34_v4  }
  0x2b   :  { %147 = vperm.xlu1 %343, %v35_v1   ;;  %345 = vset.pattern.permute.xlu0 %v403_v7 }
  0x2c   :  { %189 = vperm.xlu0 %345, %v33_v2  }
  0x2f   :  { %151 = vperm.xlu1 %343, %v36_v3  }
  0x30   :  { %201 = vperm.xlu0 %345, %v36_v3  }
  0x33   :  { %346 = vset.pattern.permute.xlu1 %v403_v7 }
  0x34   :  { %193 = vperm.xlu1 %346, %v34_v4   ;;  %348 = vset.pattern.permute.xlu0 %v400_v0 }
  0x35   :  { %245 = vperm.xlu0 %348, %v38_v8  }
  0x38   :  { %197 = vperm.xlu1 %346, %v35_v1  }
  0x3c   :  { %347 = vset.pattern.permute.xlu1 %v400_v0 }
  0x3d   :  { %240 = vperm.xlu1 %347, %v37_v9  }
  0x41   :  { %250 = vperm.xlu1 %347, %v39_v10  }
  0x45   :  { %255 = vperm.xlu1 %347, %v40_v11  }
  0x94   :  { %v54_v12 = vpop.permute.xlu1 %53  ;;  %v44_v13 = vpop.permute.xlu0 %43 }
  0x95   :  { %v80_v54 = vmul.f32 %v75_v43, %v44_v13  ;;  %v81_v55 = vmul.f32 %v79_v44, %v44_v13  ;;  %v84_v60 = vmul.f32 %v75_v43, %v54_v12  ;;  %v85_v61 = vmul.f32 %v79_v44, %v54_v12 }
  0x98   :  { %v469_v14 = vpop.permute.xlu1 %58  ;;  %v49_v15 = vpop.permute.xlu0 %48 }
  0x99   :  { %v82_v49 = vmul.f32 %v75_v43, %v49_v15  ;;  %v83_v50 = vmul.f32 %v79_v44, %v49_v15  ;;  %v86_v16 = vmul.f32 %v75_v43, %v469_v14  ;;  %v87_v12 = vmul.f32 %v79_v44, %v469_v14 }
  0x9d   :  { %v94_v17 = vpop.permute.xlu1 %93  ;;  %v90_v18 = vpop.permute.xlu0 %89 }
  0x9e   :  { %v124_v51 = vmul.f32 %v117_v39, %v94_v17  ;;  %v125_v52 = vmul.f32 %v121_v40, %v94_v17  ;;  %v122_v56 = vmul.f32 %v117_v39, %v90_v18  ;;  %v123_v57 = vmul.f32 %v121_v40, %v90_v18 }
  0xa0   :  { %v132_v1 = vadd.f32 %v124_v51, %v82_v49  ;;  %v133_v2 = vadd.f32 %v125_v52, %v83_v50  ;;  %v130_v5 = vadd.f32 %v122_v56, %v80_v54  ;;  %v131_v6 = vadd.f32 %v123_v57, %v81_v55 }
  0xa1   :  { %v98_v20 = vpop.permute.xlu1 %97  ;;  %v102_v21 = vpop.permute.xlu0 %101 }
  0xa2   :  { %v126_v3 = vmul.f32 %v117_v39, %v98_v20  ;;  %v127_v4 = vmul.f32 %v121_v40, %v98_v20  ;;  %v128_v17 = vmul.f32 %v117_v39, %v102_v21  ;;  %v129_v18 = vmul.f32 %v121_v40, %v102_v21 }
  0xa4   :  { %v134_v22 = vadd.f32 %v126_v3, %v84_v60  ;;  %v135_v23 = vadd.f32 %v127_v4, %v85_v61  ;;  %v137_v51 = vadd.f32 %v129_v18, %v87_v12  ;;  %v273_v18 = vld [vmem:[#allocation2 + $0x38] sm:$0xff] }
  0xa6   :  { %v140_v31 = vpop.permute.xlu1 %139  ;;  %v144_v32 = vpop.permute.xlu0 %143 }
  0xa7   :  { %v174_v58 = vmul.f32 %v167_v45, %v144_v32  ;;  %v175_v59 = vmul.f32 %v171_v46, %v144_v32  ;;  %v172_v7 = vmul.f32 %v167_v45, %v140_v31  ;;  %v173_v8 = vmul.f32 %v171_v46, %v140_v31  ;;  %v269_v31 = vld [vmem:[#allocation2 + $0x18] sm:$0xff]  ;;  %v276_v32 = vld [vmem:[#allocation2 + $0x50] sm:$0xff] }
  0xa9   :  { %v182_v10 = vadd.f32 %v174_v58, %v132_v1  ;;  %v183_v11 = vadd.f32 %v175_v59, %v133_v2  ;;  %v180_v26 = vadd.f32 %v172_v7, %v130_v5  ;;  %v181_v27 = vadd.f32 %v173_v8, %v131_v6  ;;  %v270_v6 = vld [vmem:[#allocation2 + $0x20] sm:$0xff]  ;;  %v271_v7 = vld [vmem:[#allocation2 + $0x28] sm:$0xff] }
  0xaa   :  { %v148_v41 = vpop.permute.xlu1 %147  ;;  %v278_v8 = vld [vmem:[#allocation2 + $0x60] sm:$0xff] }
  0xab   :  { %v190_v42 = vpop.permute.xlu0 %189  ;;  %v176_v34 = vmul.f32 %v167_v45, %v148_v41  ;;  %v177_v35 = vmul.f32 %v171_v46, %v148_v41  ;;  %v267_v41 = vld [vmem:[#allocation2 + $0x8] sm:$0xff] }
  0xac   :  { %v222_v28 = vmul.f32 %v217_v62, %v190_v42  ;;  %v223_v29 = vmul.f32 %v221_v63, %v190_v42  ;;  %v136_v42 = vadd.f32 %v128_v17, %v86_v16  ;;  %v272_v17 = vld [vmem:[#allocation2 + $0x30] sm:$0xff] }
  0xad   :  { %v184_v52 = vadd.f32 %v176_v34, %v134_v22  ;;  %v185_v54 = vadd.f32 %v177_v35, %v135_v23  ;;  %v281_v22 = vld [vmem:[#allocation2 + $0x78] sm:$0xff] }
  0xae   :  { %v152_v53 = vpop.permute.xlu1 %151  ;;  %v230_v49 = vadd.f32 %v222_v28, %v180_v26  ;;  %v231_v50 = vadd.f32 %v223_v29, %v181_v27 }
  0xaf   :  { %v202_v0 = vpop.permute.xlu0 %201  ;;  %v178_v37 = vmul.f32 %v167_v45, %v152_v53  ;;  %v179_v21 = vmul.f32 %v171_v46, %v152_v53  ;;  %v274_v45 = vld [vmem:[#allocation2 + $0x40] sm:$0xff]  ;;  %v275_v46 = vld [vmem:[#allocation2 + $0x48] sm:$0xff] }
  0xb0   :  { %v228_v55 = vmul.f32 %v217_v62, %v202_v0  ;;  %v229_v56 = vmul.f32 %v221_v63, %v202_v0 }
  0xb1   :  { %v186_v59 = vadd.f32 %v178_v37, %v136_v42  ;;  %v187_v60 = vadd.f32 %v179_v21, %v137_v51 }
  0xb3   :  { %v194_v9 = vpop.permute.xlu1 %193  ;;  %v236_v0 = vadd.f32 %v228_v55, %v186_v59 }
  0xb4   :  { %v224_v13 = vmul.f32 %v217_v62, %v194_v9  ;;  %v225_v15 = vmul.f32 %v221_v63, %v194_v9  ;;  %v246_v19 = vpop.permute.xlu0 %245  ;;  %v279_v9 = vld [vmem:[#allocation2 + $0x68] sm:$0xff] }
  0xb6   :  { %v232_v20 = vadd.f32 %v224_v13, %v182_v10  ;;  %v233_v25 = vadd.f32 %v225_v15, %v183_v11  ;;  %v237_v11 = vadd.f32 %v229_v56, %v187_v60 }
  0xb7   :  { %v198_v30 = vpop.permute.xlu1 %197 }
  0xb8   :  { %v260_v36 = vadd.f32 %v246_v19, %v232_v20  ;;  %v261_v14 = vadd.f32 %v246_v19, %v233_v25  ;;  %v226_v38 = vmul.f32 %v217_v62, %v198_v30  ;;  %v227_v39 = vmul.f32 %v221_v63, %v198_v30  ;;  %v280_v19 = vld [vmem:[#allocation2 + $0x70] sm:$0xff] }
  0xba   :  { %v284_v40 = vadd.f32 %v268_v24, %v260_v36  ;;  %v285_v43 = vadd.f32 %v269_v31, %v261_v14  ;;  %v292_v44 = vadd.f32 %v276_v32, %v260_v36  ;;  %v293_v47 = vadd.f32 %v277_v33, %v261_v14 }
  0xbb   :  { %v234_v61 = vadd.f32 %v226_v38, %v184_v52  ;;  %v235_v1 = vadd.f32 %v227_v39, %v185_v54 }
  0xbc   :  { %300 = vst [vmem:[#allocation5 + $0x10] sm:$0xff] %v284_v40  ;;  %301 = vst [vmem:[#allocation5 + $0x18] sm:$0xff] %v285_v43  ;;  %v241_v53 = vpop.permute.xlu1 %240 }
  0xbd   :  { %308 = vst [vmem:[#allocation5 + $0x50] sm:$0xff] %v292_v44  ;;  %309 = vst [vmem:[#allocation5 + $0x58] sm:$0xff] %v293_v47  ;;  %v258_v57 = vadd.f32 %v241_v53, %v230_v49  ;;  %v259_v58 = vadd.f32 %v241_v53, %v231_v50 }
  0xbf   :  { %v282_v2 = vadd.f32 %v266_v48, %v258_v57  ;;  %v283_v3 = vadd.f32 %v267_v41, %v259_v58  ;;  %v290_v4 = vadd.f32 %v274_v45, %v258_v57  ;;  %v291_v5 = vadd.f32 %v275_v46, %v259_v58 }
  0xc0   :  { %v251_v10 = vpop.permute.xlu1 %250 }
  0xc1   :  { %298 = vst [vmem:[#allocation5] sm:$0xff] %v282_v2  ;;  %299 = vst [vmem:[#allocation5 + $0x8] sm:$0xff] %v283_v3  ;;  %v262_v62 = vadd.f32 %v251_v10, %v234_v61  ;;  %v263_v63 = vadd.f32 %v251_v10, %v235_v1 }
  0xc2   :  { %306 = vst [vmem:[#allocation5 + $0x40] sm:$0xff] %v290_v4  ;;  %307 = vst [vmem:[#allocation5 + $0x48] sm:$0xff] %v291_v5 }
  0xc3   :  { %v286_v13 = vadd.f32 %v270_v6, %v262_v62  ;;  %v287_v15 = vadd.f32 %v271_v7, %v263_v63  ;;  %v294_v16 = vadd.f32 %v278_v8, %v262_v62  ;;  %v295_v12 = vadd.f32 %v279_v9, %v263_v63 }
  0xc4   :  { %v256_v23 = vpop.permute.xlu1 %255 }
  0xc5   :  { %302 = vst [vmem:[#allocation5 + $0x20] sm:$0xff] %v286_v13  ;;  %303 = vst [vmem:[#allocation5 + $0x28] sm:$0xff] %v287_v15  ;;  %v264_v24 = vadd.f32 %v256_v23, %v236_v0  ;;  %v265_v20 = vadd.f32 %v256_v23, %v237_v11 }
  0xc6   :  { %310 = vst [vmem:[#allocation5 + $0x60] sm:$0xff] %v294_v16  ;;  %311 = vst [vmem:[#allocation5 + $0x68] sm:$0xff] %v295_v12 }
  0xc7   :  { %v288_v25 = vadd.f32 %v272_v17, %v264_v24  ;;  %v289_v26 = vadd.f32 %v273_v18, %v265_v20  ;;  %v296_v27 = vadd.f32 %v280_v19, %v264_v24  ;;  %v297_v28 = vadd.f32 %v281_v22, %v265_v20 }
  0xc9   :  { %304 = vst [vmem:[#allocation5 + $0x30] sm:$0xff] %v288_v25  ;;  %305 = vst [vmem:[#allocation5 + $0x38] sm:$0xff] %v289_v26 }
  0xca   :  { %312 = vst [vmem:[#allocation5 + $0x70] sm:$0xff] %v296_v27  ;;  %313 = vst [vmem:[#allocation5 + $0x78] sm:$0xff] %v297_v28 }
  0xcb   :  { %382 = shalt.err (!%p379_p12)
}
  0xcc   :  { %s383_s22 = scalar_lea.hbm %s495_s4, 2048 }
  0xcd   :  { %p384_p13 = scmp.ne.s32.totalorder %s495_s4, %s383_s22  ;;  %p387_p0 = scmp.lt.u32.totalorder %s383_s22, %s495_s4 }
  0xcf   :  { %p389_p1 = pnand %p387_p0, %p384_p13 }
  0xd1   :  { %392 = shalt.err (!%p389_p1)
}
  0xd2   :  { %325 = dma.vmem_to_hbm [thread:$0]  %s320_s18, 2048, %s495_s4, [#allocation4], %s398_s25, %s398_s25, %s399_s26  }
  0xd3   :  { %395 = dma.done.wait [#allocation4], 2048  }
  0xd4   :  { %396 = vsyncadd [#allocation4], 4294965248 }
  0xd5   :  { %329 = vsyncpa [#allocation3], 1 }
  0xd6   :  { %330 = vsyncpa [#allocation4], 1 }

</bundles_post_ra>
